<compile_context>
chip_gen: v7x
topology: tpu7x:2x2x1
jax: 0.10.0
libtpu: 0.0.40
codegen_flags: <defaults>
</compile_context>

<pallas_src>
import functools

import jax
import jax.numpy as jnp
from jax.experimental import pallas as pl
from jax.experimental.pallas import tpu as pltpu


def dmlp_kernel(x_ref, mask_ref, wf_ref, b1_ref, w2_ref, b2_ref, o_ref,
                *, shifts, hw, unroll):
    nb = x_ref.shape[0]

    # Invariant loads hoisted out of the batch loop (loaded once per grid step).
    w_fused = wf_ref[...]                       # (hid, 9*C_pad)
    b1 = b1_ref[...]                            # (hid, 1)
    w2 = w2_ref[...]                            # (C, hid)
    b2 = b2_ref[...]                            # (C, 1)
    masks = mask_ref[...]                       # (9, 1, HW)
    mask_k = [masks[k] for k in range(9)]       # static slices, stay in vregs

    def body(n, carry):
        xb = x_ref[n]                           # (C_pad, HW): sublanes x lanes
        parts = []
        for k, s in enumerate(shifts):
            xs = xb if s == 0 else pltpu.roll(xb, shift=(-s) % hw, axis=1)
            parts.append(xs * mask_k[k])        # zero out-of-image pixels
        # Single fused contraction: K = 9*C_pad instead of 9 matmuls of K = C.
        stacked = jnp.concatenate(parts, axis=0)            # (9*C_pad, HW)
        h = jnp.dot(w_fused, stacked,
                    preferred_element_type=jnp.float32) + b1
        # tanh-approx GELU: transcendental goes to the EUP slot (nearly free)
        # instead of an erf polynomial on the VALU slot.
        h = 0.5 * h * (1.0 + jnp.tanh(0.7978845608028654
                                      * (h + 0.044715 * (h * h * h))))
        y = jnp.dot(w2, h.astype(w2.dtype),
                    preferred_element_type=jnp.float32) + b2
        o_ref[n] = y.astype(o_ref.dtype)
        return carry

    jax.lax.fori_loop(0, nb, body, 0, unroll=unroll)


def dmlp_pallas(x_nchw, w_dw, b_dw, w1, b1, w2, b2, *,
                batch_block=None, storage_dtype=None):
    """x_nchw: (N, dim, H, W); weights in PyTorch conv layouts (OIHW)."""
    N, C, H, W = x_nchw.shape
    hid = w_dw.shape[0]
    assert hid % C == 0, "hidden_dim must be a multiple of dim (groups=dim)"
    growth = hid // C
    HW = H * W
    HW_pad = ((HW + 127) // 128) * 128          # lane-dense (full vst) stores
    C_pad = ((C + 7) // 8) * 8                  # sublane-aligned tap stacking
    st = jnp.dtype(storage_dtype) if storage_dtype is not None \
        else jnp.dtype(x_nchw.dtype)

    f32 = jnp.float32
    # ---- fold dwconv3x3 (+bias) and conv1x1 (+bias) into one matmul --------
    w1_2d = w1[:, :, 0, 0].astype(f32)                      # (hid, hid)  [j, o]
    wdw_2d = w_dw[:, 0].reshape(hid, 9).astype(f32)         # (o, tap k)
    # depthwise output channel o reads input channel o // growth (groups=dim)
    expand = (jnp.arange(hid)[:, None] // growth
              == jnp.arange(C_pad)[None, :]).astype(f32)    # (o, c) zero pad cols
    # w_fused[j, k*C_pad + c] = sum_o w1[j,o] * w_dw[o,k] * [o // growth == c]
    w_fused = jnp.einsum("jo,ok,oc->jkc", w1_2d, wdw_2d, expand)
    w_fused = w_fused.reshape(hid, 9 * C_pad)
    b1f = (b1.astype(f32) + w1_2d @ b_dw.astype(f32)).reshape(hid, 1)
    w2_2d = w2[:, :, 0, 0].astype(f32)                      # (C, hid)
    b2_2d = b2.astype(f32).reshape(C, 1)

    # ---- per-tap boundary masks, precomputed on the host (loaded once) -----
    taps = [(k // 3 - 1, k % 3 - 1) for k in range(9)]
    shifts = tuple(dy * W + dx for dy, dx in taps)
    p = jnp.arange(HW_pad)
    hh, ww = p // W, p % W
    masks = jnp.stack([
        (p < HW) & (hh + dy >= 0) & (hh + dy < H) & (ww + dx >= 0) & (ww + dx < W)
        for dy, dx in taps
    ]).reshape(9, 1, HW_pad)

    # ---- lane-dense activations (N, C_pad, HW_pad), zero padded -------------
    x_flat = x_nchw.reshape(N, C, HW)
    if C_pad != C or HW_pad != HW:
        x_flat = jnp.pad(x_flat, ((0, 0), (0, C_pad - C), (0, HW_pad - HW)))
    x_flat = x_flat.astype(st)
    masks = masks.astype(st)
    w_fused = w_fused.astype(st)
    w2_in = w2_2d.astype(st)

    # ---- batch blocking: amortize grid-step overhead, keep grid >= 2 --------
    itemsize = st.itemsize
    per_image = C_pad * HW_pad * itemsize
    if batch_block is None:
        batch_block = max(1, (4 << 20) // max(1, per_image))   # ~4 MiB in-block
    nb = max(1, min(N, batch_block))
    if N >= 2:
        nb = max(1, min(nb, N // 2))     # both v7x TensorCores get work
    while N % nb:                        # exact blocks only
        nb -= 1
    grid = (N // nb,)

    unroll = 1
    for u in (4, 2):
        if nb % u == 0:
            unroll = u
            break

    out_itemsize = jnp.dtype(x_nchw.dtype).itemsize
    live_bytes = (2 * nb * HW_pad * (C_pad * itemsize + C * out_itemsize)
                  + (9 * C_pad + hid + C) * HW_pad * 4
                  + (w_fused.size + 9 * HW_pad + w2_in.size) * itemsize
                  + (hid + C) * 4)
    if live_bytes > (12 << 20):
        compiler_params = pltpu.CompilerParams(
            dimension_semantics=("parallel",),
            vmem_limit_bytes=int(min(48 << 20, live_bytes * 3 // 2)))
    else:
        compiler_params = pltpu.CompilerParams(
            dimension_semantics=("parallel",))

    kernel = functools.partial(dmlp_kernel, shifts=shifts, hw=HW_pad,
                               unroll=unroll)
    out = pl.pallas_call(
        kernel,
        out_shape=jax.ShapeDtypeStruct((N, C, HW_pad), x_nchw.dtype),
        grid_spec=pltpu.PrefetchScalarGridSpec(
            num_scalar_prefetch=0,
            grid=grid,
            in_specs=[
                pl.BlockSpec((nb, C_pad, HW_pad), lambda b: (b, 0, 0)),  # x
                pl.BlockSpec((9, 1, HW_pad), lambda b: (0, 0, 0)),       # masks
                pl.BlockSpec((hid, 9 * C_pad), lambda b: (0, 0)),        # fused taps
                pl.BlockSpec((hid, 1), lambda b: (0, 0)),                # fused bias 1
                pl.BlockSpec((C, hid), lambda b: (0, 0)),                # w2
                pl.BlockSpec((C, 1), lambda b: (0, 0)),                  # b2
            ],
            out_specs=pl.BlockSpec((nb, C, HW_pad), lambda b: (b, 0, 0)),
        ),
        compiler_params=compiler_params,
    )(x_flat, masks, w_fused, b1f, w2_in, b2_2d)

    if HW_pad != HW:
        out = out[:, :, :HW]
    return out.reshape(N, C, H, W)
    # TODO(synk): for very large H*W on v7x (64 MiB VMEM) add an HW tile axis
    # with a one-row halo; not needed at these sizes.


def dmlp_ref(x, w_dw, b_dw, w1, b1, w2, b2, groups):
    """Pure-JAX reference mirroring the PyTorch module (NCHW, OIHW, exact GELU)."""
    dn = ("NCHW", "OIHW", "NCHW")
    y = jax.lax.conv_general_dilated(x, w_dw, (1, 1), ((1, 1), (1, 1)),
                                     dimension_numbers=dn,
                                     feature_group_count=groups)
    y = y + b_dw[None, :, None, None]
    y = jax.lax.conv_general_dilated(y, w1, (1, 1), "VALID", dimension_numbers=dn)
    y = y + b1[None, :, None, None]
    y = jax.nn.gelu(y, approximate=False)
    y = jax.lax.conv_general_dilated(y, w2, (1, 1), "VALID", dimension_numbers=dn)
    y = y + b2[None, :, None, None]
    return y


if __name__ == "__main__":
    dim = 4
    growth_rate = 2.0
    hidden_dim = int(dim * growth_rate)     # 8
    N, H, W = 2, 16, 16

    key = jax.random.PRNGKey(0)
    kx, k0, k1, k2, k3, k4, k5 = jax.random.split(key, 7)

    x = jax.random.normal(kx, (N, dim, H, W), jnp.float32)

    # Parameters in PyTorch layouts, deterministic synthetic init.
    w_dw = 0.2 * jax.random.normal(k0, (hidden_dim, 1, 3, 3), jnp.float32)  # groups=dim
    b_dw = 0.1 * jax.random.normal(k1, (hidden_dim,), jnp.float32)
    w1 = 0.2 * jax.random.normal(k2, (hidden_dim, hidden_dim, 1, 1), jnp.float32)
    b1 = 0.1 * jax.random.normal(k3, (hidden_dim,), jnp.float32)
    w2 = 0.2 * jax.random.normal(k4, (dim, hidden_dim, 1, 1), jnp.float32)
    b2 = 0.1 * jax.random.normal(k5, (dim,), jnp.float32)

    out = dmlp_pallas(x, w_dw, b_dw, w1, b1, w2, b2)
    out = jax.block_until_ready(out)

    ref = dmlp_ref(x, w_dw, b_dw, w1, b1, w2, b2, groups=dim)
    ref = jax.block_until_ready(ref)

    assert out.shape == (N, dim, H, W)
    # Tolerance covers the tanh-GELU approximation vs the exact-erf reference.
    assert jnp.allclose(out, ref, rtol=2e-3, atol=2e-3), \
        f"max abs err = {jnp.max(jnp.abs(out - ref))}"

    print("KERNEL_OK")
</pallas_src>

<mosaic_0001>
module attributes {stable_mosaic.version = 11 : i64} {
  func.func @dmlp_kernel(%arg0: i32, %arg1: memref<1x8x256xf32, #tpu.memory_space<vmem>>, %arg2: memref<9x1x256xf32, #tpu.memory_space<vmem>>, %arg3: memref<8x72xf32, #tpu.memory_space<vmem>>, %arg4: memref<8x1xf32, #tpu.memory_space<vmem>>, %arg5: memref<4x8xf32, #tpu.memory_space<vmem>>, %arg6: memref<4x1xf32, #tpu.memory_space<vmem>>, %arg7: memref<1x4x256xf32, #tpu.memory_space<vmem>>) attributes {dimension_semantics = [#tpu.dimension_semantics<parallel>], iteration_bounds = array<i64: 2>, scalar_prefetch = 0 : i64, scratch_operands = 0 : i64, tpu.core_type = #tpu.core_type<tc>, window_params = [{transform_indices = @transform_0, window_bounds = array<i64: 1, 8, 256>}, {pipeline_mode = #tpu.pipeline_mode<synchronous>, transform_indices = @transform_1, window_bounds = array<i64: 9, 1, 256>}, {pipeline_mode = #tpu.pipeline_mode<synchronous>, transform_indices = @transform_2, window_bounds = array<i64: 8, 72>}, {pipeline_mode = #tpu.pipeline_mode<synchronous>, transform_indices = @transform_3, window_bounds = array<i64: 8, 1>}, {pipeline_mode = #tpu.pipeline_mode<synchronous>, transform_indices = @transform_4, window_bounds = array<i64: 4, 8>}, {pipeline_mode = #tpu.pipeline_mode<synchronous>, transform_indices = @transform_5, window_bounds = array<i64: 4, 1>}, {transform_indices = @transform_6, window_bounds = array<i64: 1, 4, 256>}]} {
    %c0 = arith.constant 0 : index
    %c0_0 = arith.constant 0 : index
    %0 = vector.load %arg3[%c0, %c0_0] : memref<8x72xf32, #tpu.memory_space<vmem>>, vector<8x72xf32>
    %c0_1 = arith.constant 0 : index
    %c0_2 = arith.constant 0 : index
    %1 = vector.load %arg4[%c0_1, %c0_2] : memref<8x1xf32, #tpu.memory_space<vmem>>, vector<8x1xf32>
    %c0_3 = arith.constant 0 : index
    %c0_4 = arith.constant 0 : index
    %2 = vector.load %arg5[%c0_3, %c0_4] : memref<4x8xf32, #tpu.memory_space<vmem>>, vector<4x8xf32>
    %c0_5 = arith.constant 0 : index
    %c0_6 = arith.constant 0 : index
    %3 = vector.load %arg6[%c0_5, %c0_6] : memref<4x1xf32, #tpu.memory_space<vmem>>, vector<4x1xf32>
    %c0_7 = arith.constant 0 : index
    %c0_8 = arith.constant 0 : index
    %c0_9 = arith.constant 0 : index
    %4 = vector.load %arg2[%c0_7, %c0_8, %c0_9] : memref<9x1x256xf32, #tpu.memory_space<vmem>>, vector<9x1x256xf32>
    %5 = vector.extract_strided_slice %4 {offsets = [0, 0, 0], sizes = [1, 1, 256], strides = [1, 1, 1]} : vector<9x1x256xf32> to vector<1x1x256xf32>
    %6 = vector.shape_cast %5 : vector<1x1x256xf32> to vector<1x256xf32>
    %7 = vector.extract_strided_slice %4 {offsets = [1, 0, 0], sizes = [1, 1, 256], strides = [1, 1, 1]} : vector<9x1x256xf32> to vector<1x1x256xf32>
    %8 = vector.shape_cast %7 : vector<1x1x256xf32> to vector<1x256xf32>
    %9 = vector.extract_strided_slice %4 {offsets = [2, 0, 0], sizes = [1, 1, 256], strides = [1, 1, 1]} : vector<9x1x256xf32> to vector<1x1x256xf32>
    %10 = vector.shape_cast %9 : vector<1x1x256xf32> to vector<1x256xf32>
    %11 = vector.extract_strided_slice %4 {offsets = [3, 0, 0], sizes = [1, 1, 256], strides = [1, 1, 1]} : vector<9x1x256xf32> to vector<1x1x256xf32>
    %12 = vector.shape_cast %11 : vector<1x1x256xf32> to vector<1x256xf32>
    %13 = vector.extract_strided_slice %4 {offsets = [4, 0, 0], sizes = [1, 1, 256], strides = [1, 1, 1]} : vector<9x1x256xf32> to vector<1x1x256xf32>
    %14 = vector.shape_cast %13 : vector<1x1x256xf32> to vector<1x256xf32>
    %15 = vector.extract_strided_slice %4 {offsets = [5, 0, 0], sizes = [1, 1, 256], strides = [1, 1, 1]} : vector<9x1x256xf32> to vector<1x1x256xf32>
    %16 = vector.shape_cast %15 : vector<1x1x256xf32> to vector<1x256xf32>
    %17 = vector.extract_strided_slice %4 {offsets = [6, 0, 0], sizes = [1, 1, 256], strides = [1, 1, 1]} : vector<9x1x256xf32> to vector<1x1x256xf32>
    %18 = vector.shape_cast %17 : vector<1x1x256xf32> to vector<1x256xf32>
    %19 = vector.extract_strided_slice %4 {offsets = [7, 0, 0], sizes = [1, 1, 256], strides = [1, 1, 1]} : vector<9x1x256xf32> to vector<1x1x256xf32>
    %20 = vector.shape_cast %19 : vector<1x1x256xf32> to vector<1x256xf32>
    %21 = vector.extract_strided_slice %4 {offsets = [8, 0, 0], sizes = [1, 1, 256], strides = [1, 1, 1]} : vector<9x1x256xf32> to vector<1x1x256xf32>
    %22 = vector.shape_cast %21 : vector<1x1x256xf32> to vector<1x256xf32>
    %c0_i32 = arith.constant 0 : i32
    %23 = arith.index_cast %c0_i32 : i32 to index
    %c0_10 = arith.constant 0 : index
    %c0_11 = arith.constant 0 : index
    %24 = vector.load %arg1[%23, %c0_10, %c0_11] : memref<1x8x256xf32, #tpu.memory_space<vmem>>, vector<1x8x256xf32>
    %25 = vector.shape_cast %24 : vector<1x8x256xf32> to vector<8x256xf32>
    %c17_i32 = arith.constant 17 : i32
    %26 = tpu.dynamic_rotate %25 by %c17_i32 dim 1 : vector<8x256xf32>, i32 -> vector<8x256xf32>
    %27 = vector.broadcast %6 : vector<1x256xf32> to vector<8x256xf32>
    %28 = arith.mulf %26, %27 : vector<8x256xf32>
    %c16_i32 = arith.constant 16 : i32
    %29 = tpu.dynamic_rotate %25 by %c16_i32 dim 1 : vector<8x256xf32>, i32 -> vector<8x256xf32>
    %30 = vector.broadcast %8 : vector<1x256xf32> to vector<8x256xf32>
    %31 = arith.mulf %29, %30 : vector<8x256xf32>
    %c15_i32 = arith.constant 15 : i32
    %32 = tpu.dynamic_rotate %25 by %c15_i32 dim 1 : vector<8x256xf32>, i32 -> vector<8x256xf32>
    %33 = vector.broadcast %10 : vector<1x256xf32> to vector<8x256xf32>
    %34 = arith.mulf %32, %33 : vector<8x256xf32>
    %c1_i32 = arith.constant 1 : i32
    %35 = tpu.dynamic_rotate %25 by %c1_i32 dim 1 : vector<8x256xf32>, i32 -> vector<8x256xf32>
    %36 = vector.broadcast %12 : vector<1x256xf32> to vector<8x256xf32>
    %37 = arith.mulf %35, %36 : vector<8x256xf32>
    %38 = vector.broadcast %14 : vector<1x256xf32> to vector<8x256xf32>
    %39 = arith.mulf %25, %38 : vector<8x256xf32>
    %c255_i32 = arith.constant 255 : i32
    %40 = tpu.dynamic_rotate %25 by %c255_i32 dim 1 : vector<8x256xf32>, i32 -> vector<8x256xf32>
    %41 = vector.broadcast %16 : vector<1x256xf32> to vector<8x256xf32>
    %42 = arith.mulf %40, %41 : vector<8x256xf32>
    %c241_i32 = arith.constant 241 : i32
    %43 = tpu.dynamic_rotate %25 by %c241_i32 dim 1 : vector<8x256xf32>, i32 -> vector<8x256xf32>
    %44 = vector.broadcast %18 : vector<1x256xf32> to vector<8x256xf32>
    %45 = arith.mulf %43, %44 : vector<8x256xf32>
    %c240_i32 = arith.constant 240 : i32
    %46 = tpu.dynamic_rotate %25 by %c240_i32 dim 1 : vector<8x256xf32>, i32 -> vector<8x256xf32>
    %47 = vector.broadcast %20 : vector<1x256xf32> to vector<8x256xf32>
    %48 = arith.mulf %46, %47 : vector<8x256xf32>
    %c239_i32 = arith.constant 239 : i32
    %49 = tpu.dynamic_rotate %25 by %c239_i32 dim 1 : vector<8x256xf32>, i32 -> vector<8x256xf32>
    %50 = vector.broadcast %22 : vector<1x256xf32> to vector<8x256xf32>
    %51 = arith.mulf %49, %50 : vector<8x256xf32>
    %52 = tpu.concatenate %28, %31, %34, %37, %39, %42, %45, %48, %51 in 0 : vector<8x256xf32>, vector<8x256xf32>, vector<8x256xf32>, vector<8x256xf32>, vector<8x256xf32>, vector<8x256xf32>, vector<8x256xf32>, vector<8x256xf32>, vector<8x256xf32> -> vector<72x256xf32>
    %cst = arith.constant dense<0.000000e+00> : vector<8x256xf32>
    %53 = tpu.matmul %0, %52, %cst {dimension_numbers = #tpu.dot_dimension_numbers<[1], [0], [0], [1], [0, 0, 1, 1], [], []>} : vector<8x72xf32>, vector<72x256xf32>, vector<8x256xf32> -> vector<8x256xf32>
    %54 = vector.broadcast %1 : vector<8x1xf32> to vector<8x256xf32>
    %55 = arith.addf %53, %54 : vector<8x256xf32>
    %cst_12 = arith.constant 5.000000e-01 : f32
    %56 = vector.broadcast %cst_12 : f32 to vector<8x256xf32>
    %57 = arith.mulf %56, %55 : vector<8x256xf32>
    %58 = arith.mulf %55, %55 : vector<8x256xf32>
    %59 = arith.mulf %58, %55 : vector<8x256xf32>
    %cst_13 = arith.constant 4.471500e-02 : f32
    %60 = vector.broadcast %cst_13 : f32 to vector<8x256xf32>
    %61 = arith.mulf %60, %59 : vector<8x256xf32>
    %62 = arith.addf %55, %61 : vector<8x256xf32>
    %cst_14 = arith.constant 0.797884583 : f32
    %63 = vector.broadcast %cst_14 : f32 to vector<8x256xf32>
    %64 = arith.mulf %63, %62 : vector<8x256xf32>
    %65 = math.tanh %64 : vector<8x256xf32>
    %cst_15 = arith.constant 1.000000e+00 : f32
    %66 = vector.broadcast %cst_15 : f32 to vector<8x256xf32>
    %67 = arith.addf %66, %65 : vector<8x256xf32>
    %68 = arith.mulf %57, %67 : vector<8x256xf32>
    %cst_16 = arith.constant dense<0.000000e+00> : vector<4x256xf32>
    %69 = tpu.matmul %2, %68, %cst_16 {dimension_numbers = #tpu.dot_dimension_numbers<[1], [0], [0], [1], [0, 0, 1, 1], [], []>} : vector<4x8xf32>, vector<8x256xf32>, vector<4x256xf32> -> vector<4x256xf32>
    %70 = vector.broadcast %3 : vector<4x1xf32> to vector<4x256xf32>
    %71 = arith.addf %69, %70 : vector<4x256xf32>
    %72 = arith.index_cast %c0_i32 : i32 to index
    %c0_17 = arith.constant 0 : index
    %c0_18 = arith.constant 0 : index
    %73 = vector.load %arg7[%72, %c0_17, %c0_18] : memref<1x4x256xf32, #tpu.memory_space<vmem>>, vector<1x4x256xf32>
    %74 = vector.shape_cast %73 : vector<1x4x256xf32> to vector<4x256xf32>
    %75 = vector.shape_cast %71 : vector<4x256xf32> to vector<1x4x256xf32>
    tpu.vector_store %arg7[%72, %c0_17, %c0_18], %75 {strides = array<i32>} : memref<1x4x256xf32, #tpu.memory_space<vmem>>, vector<1x4x256xf32>,
    %c1_i32_19 = arith.constant 1 : i32
    return
  }
  func.func @transform_0(%arg0: i32) -> (i32, i32, i32) {
    %c0_i32 = arith.constant 0 : i32
    %c0_i32_0 = arith.constant 0 : i32
    %c0_i32_1 = arith.constant 0 : i32
    return %arg0, %c0_i32, %c0_i32_0 : i32, i32, i32
  }
  func.func @transform_1(%arg0: i32) -> (i32, i32, i32) {
    %c0_i32 = arith.constant 0 : i32
    %c0_i32_0 = arith.constant 0 : i32
    %c0_i32_1 = arith.constant 0 : i32
    %c0_i32_2 = arith.constant 0 : i32
    return %c0_i32, %c0_i32_0, %c0_i32_1 : i32, i32, i32
  }
  func.func @transform_2(%arg0: i32) -> (i32, i32) {
    %c0_i32 = arith.constant 0 : i32
    %c0_i32_0 = arith.constant 0 : i32
    %c0_i32_1 = arith.constant 0 : i32
    return %c0_i32, %c0_i32_0 : i32, i32
  }
  func.func @transform_3(%arg0: i32) -> (i32, i32) {
    %c0_i32 = arith.constant 0 : i32
    %c0_i32_0 = arith.constant 0 : i32
    %c0_i32_1 = arith.constant 0 : i32
    return %c0_i32, %c0_i32_0 : i32, i32
  }
  func.func @transform_4(%arg0: i32) -> (i32, i32) {
    %c0_i32 = arith.constant 0 : i32
    %c0_i32_0 = arith.constant 0 : i32
    %c0_i32_1 = arith.constant 0 : i32
    return %c0_i32, %c0_i32_0 : i32, i32
  }
  func.func @transform_5(%arg0: i32) -> (i32, i32) {
    %c0_i32 = arith.constant 0 : i32
    %c0_i32_0 = arith.constant 0 : i32
    %c0_i32_1 = arith.constant 0 : i32
    return %c0_i32, %c0_i32_0 : i32, i32
  }
  func.func @transform_6(%arg0: i32) -> (i32, i32, i32) {
    %c0_i32 = arith.constant 0 : i32
    %c0_i32_0 = arith.constant 0 : i32
    %c0_i32_1 = arith.constant 0 : i32
    return %arg0, %c0_i32, %c0_i32_0 : i32, i32, i32
  }
}

</mosaic_0001>

<bundles_post_ra>
// kernel: tpu_custom_call.1
= control target key start
LH: loop header
LB: loop body
LE: loop exit
PB: predicated region body
PF: predicated region fallthrough
CT: control target
= control target key end

     0   :  { %11 = vsyncpa [#allocation3], 0  ;;  %s1313_s0 = inlined_call_operand.hbm [shape: f32[2,8,256], index: 0, kind: input, shape index: {}]   ;;  %s1314_s1 = inlined_call_operand.hbm [shape: f32[9,1,256], index: 1, kind: input, shape index: {}]   ;;  %s1315_s2 = inlined_call_operand.vmem [shape: f32[8,72], index: 2, kind: input, shape index: {}]   ;;  %s1316_s3 = inlined_call_operand.vmem [shape: f32[8,1], index: 3, kind: input, shape index: {}]   ;;  %s1317_s4 = inlined_call_operand.vmem [shape: f32[4,8], index: 4, kind: input, shape index: {}]   ;;  %s1318_s5 = inlined_call_operand.vmem [shape: f32[4,1], index: 5, kind: input, shape index: {}]   ;;  %s1319_s6 = inlined_call_operand.hbm [shape: f32[2,4,256], index: 6, kind: output, shape index: {}]  }
   0x1   :  { %13 = vsyncpa [#allocation3 + $0x1], 0 }
   0x2   :  { %14 = vsyncpa [#allocation6], 0 }
   0x3   :  { %15 = vsyncpa [#allocation4], 0 }
   0x4   :  { %17 = vsyncpa [#allocation4 + $0x1], 0  ;;  %s1042_s21 = smov 0   ;;  %s1044_s22 = smov 0  }
   0x5   :  { %s1046_s23 = smov 0   ;;  %s1048_s24 = smov 0  }
   0x6 LB: > { %s1063_s25 = sadd.s32 4294967295, %s990_s24   ;;  %s751_s26 = sadd.s32 4294967294, %s990_s24   ;;  %s990_s24 = sphi %s1048_s24, %s1339_s24   ;;  %s986_s23 = sphi %s1046_s23, %s1338_s23   ;;  %s982_s22 = sphi %s1044_s22, %s1337_s22   ;;  %s978_s21 = sphi %s1042_s21, %s1336_s21  }
   0x7   : > { %p43_p0 = scmp.ne.s32.totalorder %s982_s22, %s978_s21  ;;  %p1320_p1 = scmp.eq.s32.totalorder %s1063_s25, 0 }
   0x8   : > { %p178_p3 = scmp.eq.s32.totalorder %s751_s26, 1  ;;  %p752_p5 = scmp.ge.s32.totalorder %s990_s24, 1 }
   0x9   : > { %p1072_p4 = por %p1320_p1, %p43_p0  ;;  %p185_p7 = scmp.lt.s32.totalorder %s990_s24, 3 }
   0xa   : > { %p1077_p6 = por %p178_p3, %p43_p0  ;;  %s992_s30 = smov [#allocation5]  }
   0xb   : > { %s1323_s27 = scalar_select %p1072_p4, 1, 0 }
   0xc   : > { %s1324_s28 = scalar_select %p1077_p6, 1, 0 }
   0xd   : > { %p1082_p8 = pnand %p752_p5, %p185_p7  ;;  %s197_s7 = sshll.u32 %s992_s30, 4  ;;  %s1086_s7 = int_to_ptr.vmem [resolvable:$true] %s197_s7 }
   0xe   : > { %s1098_s9 = sadd.s32 1, %s990_s24   ;;  %s30_s10 = sadd.s32 1, %s986_s23 }
   0xf   : > { %s1325_s29 = scalar_select %p1082_p8, 1, 0 }
  0x10   : > { %p795_p9 = pneg %p1082_p8  ;;  %s27_s11 = ssub.s32 %s990_s24, %s1098_s9 }
  0x11   : > { %s862_s14 = scalar_lea.hbm %s1314_s1, 288 }
  0x12   : > { %p1093_p11 = pnand %p795_p9, %p1320_p1  ;;  %p863_p12 = scmp.ne.s32.totalorder %s1314_s1, %s862_s14 }
  0x13   : > { %p869_p5 = scmp.lt.u32.totalorder %s862_s14, %s1314_s1 }
  0x14   : > { %p864_p13 = pneg %p1093_p11 }
  0x16   : > { %p865_p0 = pnand %p864_p13, %p863_p12 }
  0x18   : > { %p866_p3 = pneg %p865_p0 }
  0x1a   : > { %p871_p7 = pnand %p869_p5, %p866_p3 }
  0x1c   : > { %874 = shalt.err (!%p871_p7)
}
  0x1d   : > { %s875_s19 = scalar_lea.vmem %s1086_s7, 288  ;;  %p883_p2 = scmp.lt.s32.totalorder %s1086_s7, %s1086_s7 }
  0x1e   : > { %p876_p9 = scmp.ne.s32.totalorder %s1086_s7, %s875_s19  ;;  %p884_p6 = scmp.lt.s32.totalorder %s875_s19, %s875_s19 }
  0x20   : > { %p878_p10 = pnand %p876_p9, %p864_p13  ;;  %p885_p4 = por %p884_p6, %p883_p2 }
  0x22   : > { %p879_p1 = pneg %p878_p10 }
  0x24   : > { %p886_p8 = pnand %p885_p4, %p879_p1 }
  0x26   : > { %889 = shalt.err (!%p886_p8)
}
  0x27   : > { %s993_s20 = smov 32   ;;  %s994_s26 = smov 2  }
  0x28   : > { %798 = dma.hbm_to_vmem [thread:$0]  (!%p1093_p11), %s1314_s1, 288, %s1086_s7, [#allocation6], %s993_s20, %s993_s20, %s994_s26  }
  0x29   : > { %p28_p2 = scmp.eq.s32.totalorder %s27_s11, 0  ;;  %p37_p1 = scmp.ne.s32.totalorder %s986_s23, %s982_s22 }
  0x2a   : > { %p38_p4 = scmp.eq.s32.totalorder %s990_s24, 0  ;;  %p808_p6 = scmp.lt.s32.totalorder %s990_s24, 2 }
  0x2b   : > { %s1129_s13 = scalar_select %p28_p2, %s986_s23, %s30_s10  }
  0x2c   : > { %p39_p8 = por %p38_p4, %p37_p1  ;;  %p1327_p10 = scmp.eq.s32.totalorder %s1063_s25, 1 }
  0x2d   : > { %s223_s15 = sand.u32 1, %s986_s23   ;;  %s769_s16 = sshll.u32 %s990_s24, 8 }
  0x2e   : > { %p1133_p12 = por %p1327_p10, %p37_p1  ;;  %s755_s17 = sshll.u32 %s223_s15, 4 }
  0x2f   : > { %s1142_s19 = scalar_lea.hbm %s1313_s0, %s769_s16  ;;  %s227_s7 = scalar_lea.vmem [#allocation2], %s755_s17 }
  0x30   : > { %s235_s10 = sshll.u32 %s227_s7, 4  ;;  %p1144_p11 = pnand %p808_p6, %p39_p8  ;;  %s1148_s10 = int_to_ptr.vmem [resolvable:$true] %s235_s10 }
  0x31   : > { %s224_s20 = scalar_lea.sflag [#allocation3], %s223_s15  ;;  %s890_s26 = scalar_lea.hbm %s1142_s19, 256 }
  0x32   : > { %p891_p13 = scmp.ne.s32.totalorder %s1142_s19, %s890_s26  ;;  %p892_p0 = pneg %p1144_p11 }
  0x33   : > { %s895_s16 = scalar_lea.hbm %s1313_s0, 512  ;;  %p896_p7 = scmp.lt.u32.totalorder %s1142_s19, %s1313_s0 }
  0x34   : > { %p893_p3 = pnand %p892_p0, %p891_p13  ;;  %p897_p9 = scmp.lt.u32.totalorder %s895_s16, %s890_s26 }
  0x35   : > { %p899_p1 = scmp.lt.u32.totalorder %s890_s26, %s1142_s19 }
  0x36   : > { %p894_p5 = pneg %p893_p3  ;;  %p898_p2 = por %p897_p9, %p896_p7 }
  0x38   : > { %p900_p4 = por %p899_p1, %p898_p2 }
  0x3a   : > { %p901_p6 = pnand %p900_p4, %p894_p5 }
  0x3c   : > { %904 = shalt.err (!%p901_p6)
}
  0x3d   : > { %s905_s15 = scalar_lea.vmem %s1148_s10, 256  ;;  %s995_s18 = smov [#allocation2]  }
  0x3e   : > { %p906_p8 = scmp.ne.s32.totalorder %s1148_s10, %s905_s15  ;;  %s910_s7 = sshll.u32 %s995_s18, 4  ;;  %s911_s7 = int_to_ptr.vmem [resolvable:$false] %s910_s7 }
  0x3f   : > { %s912_s30 = scalar_lea.vmem %s911_s7, 512  ;;  %p913_p3 = scmp.lt.s32.totalorder %s1148_s10, %s911_s7 }
  0x40   : > { %p908_p10 = pnand %p906_p8, %p892_p0  ;;  %p914_p7 = scmp.lt.s32.totalorder %s912_s30, %s905_s15 }
  0x42   : > { %p909_p13 = pneg %p908_p10  ;;  %p915_p9 = por %p914_p7, %p913_p3 }
  0x44   : > { %p916_p2 = pnand %p915_p9, %p909_p13 }
  0x46   : > { %919 = shalt.err (!%p916_p2)
}
  0x47   : > { %802 = dma.hbm_to_vmem [thread:$0]  (!%p1144_p11), %s1142_s19, 256, %s1148_s10, %s224_s20  }
  0x48   : > { %p1330_p5 = scmp.ne.s32.totalorder %s1325_s29, 0 }
  0x49   : > { %s1178_s26 = sand.u32 (!%p1330_p5), 1, %s982_s22   ;;  %p1331_p0 = scmp.ne.s32.totalorder (!%p1330_p5), %s1323_s27, 0 }
  0x4a   : > { %244 = sbr.rel (%p1330_p5) target bundleno = 709 (0x2c5), region = 44  ;;  %s759_s12 = sshll.u32 (!%p1330_p5), %s1178_s26, 4 }
  0x4b   : > { %s247_s16 = scalar_lea.sflag (!%p1330_p5), [#allocation3], %s1178_s26  ;;  %s250_s17 = scalar_lea.vmem (!%p1330_p5), [#allocation2], %s759_s12 }
  0x51   : > { %965 = dma.done.wait (%p1331_p0), %s247_s16, 256  }
  0x52   : > { %967 = vsyncadd (%p1331_p0), %s247_s16, 4294967040  ;;  %p1332_p1 = scmp.eq.s32.totalorder %s1063_s25, 0 }
  0x54   : > { %969 = dma.done.wait (%p1332_p1), [#allocation6], 288   ;;  %p1333_p11 = pmov %p1332_p1 }
  0x55   : > { %v1190_v0 = vld [vmem:[%s250_s17] sm:$0xff]  ;;  %s996_s29 = smov 16   ;;  %s997_s19 = smov 17   ;;  %v1194_v1 = vld [vmem:[%s250_s17 + $0x8] sm:$0xff]  ;;  %v1002_v2 = vmov 0.0   ;;  %v1003_v3 = vmov 0   ;;  %v302_v5 = vlaneseq }
  0x56   : > { %971 = vsyncadd (%p1333_p11), [#allocation6], 4294967008  ;;  %320 = vrot.lane.b32.xlu1 %v1190_v0, %s996_s29  ;;  %298 = vrot.lane.b32.xlu0 %v1190_v0, %s997_s19  ;;  %s998_s27 = smov 15   ;;  %s999_s10 = smov 1   ;;  %v284_v4 = vld [vmem:[%s1316_s3] sm:$0xff]  ;;  %vm478_vm8 = vcmask 588800  }
  0x57   : > { %s1000_s11 = smov 127   ;;  %s1001_s20 = smov 113   ;;  %546 = vmatprep.mubr.f32.mxu0 %v1002_v2  ;;  %644 = vmatprep.mubr.f32.mxu1 %v1002_v2  ;;  %v309_v6 = vshrl.u32 %v302_v5, 7  ;;  %v1213_v7 = vand.u32 127, %v302_v5  ;;  %v288_v10 = vld [vmem:[#allocation5 + $0x2] sm:$0x3] }
  0x58   : > { %856 = vset.pattern.permute.xlu0 %v1003_v3  ;;  %857 = vset.pattern.permute.xlu1 %v1003_v3  ;;  %s1004_s8 = smov 112   ;;  %s1005_s15 = smov 111   ;;  %v287_v11 = vld [vmem:[#allocation5] sm:$0x3]  ;;  %v289_v28 = vld [vmem:[#allocation5 + $0x4] sm:$0x3] }
  0x59   : > { %v1215_v8 = vsub.s32 0, %v309_v6  ;;  %v1217_v9 = vsub.s32 1, %v309_v6  ;;  %vm324_vm0 = vcmp.lt.s32.totalorder %v1213_v7, 16  ;;  %vm304_vm1 = vcmp.lt.s32.totalorder %v1213_v7, 17  ;;  %v290_v29 = vld [vmem:[#allocation5 + $0x6] sm:$0x3] }
  0x5a   : > { %322 = vrot.lane.b32.xlu1 %v1194_v1, %s996_s29  ;;  %300 = vrot.lane.b32.xlu0 %v1194_v1, %s997_s19  ;;  %vm344_vm2 = vcmp.lt.s32.totalorder %v1213_v7, 15  ;;  %vm364_vm3 = vcmp.lt.s32.totalorder %v1213_v7, 1  ;;  %v291_v34 = vld [vmem:[#allocation5 + $0x8] sm:$0x3]  ;;  %v292_v39 = vld [vmem:[#allocation5 + $0xa] sm:$0x3] }
  0x5b   : > { %v331_v14 = vrot.slane %v288_v10, %v1215_v8  ;;  %v311_v15 = vrot.slane %v287_v11, %v1215_v8  ;;  %v315_v16 = vrot.slane %v287_v11, %v1217_v9  ;;  %v335_v17 = vrot.slane %v288_v10, %v1217_v9  ;;  %v293_v2 = vld [vmem:[#allocation5 + $0xc] sm:$0x3]  ;;  %v294_v3 = vld [vmem:[#allocation5 + $0xe] sm:$0x3]  ;;  %s657_s7 = scalar_lea.sflag [#allocation4], %s1178_s26 }
  0x5c   : > { %v351_v35 = vrot.slane %v289_v28, %v1215_v8  ;;  %v355_v36 = vrot.slane %v289_v28, %v1217_v9  ;;  %v371_v37 = vrot.slane %v290_v29, %v1215_v8  ;;  %v375_v38 = vrot.slane %v290_v29, %v1217_v9 }
  0x5d   : > { %vm397_vm4 = vcmp.lt.s32.totalorder %v1213_v7, 127  ;;  %v388_v44 = vrot.slane %v291_v34, %v1217_v9  ;;  %v384_v45 = vrot.slane %v291_v34, %v1215_v8  ;;  %v404_v48 = vrot.slane %v292_v39, %v1215_v8 }
  0x5e   : > { %342 = vrot.lane.b32.xlu1 %v1194_v1, %s998_s27  ;;  %340 = vrot.lane.b32.xlu0 %v1190_v0, %s998_s27  ;;  %v408_v49 = vrot.slane %v292_v39, %v1217_v9  ;;  %vm417_vm5 = vcmp.lt.s32.totalorder %v1213_v7, 113  ;;  %v428_v10 = vrot.slane %v293_v2, %v1217_v9  ;;  %vm437_vm6 = vcmp.lt.s32.totalorder %v1213_v7, 112  ;;  %s761_s27 = sshll.u32 %s1178_s26, 3 }
  0x5f   : > { %v392_v58 = vmul.f32 %v388_v44, %v1194_v1  ;;  %v391_v59 = vmul.f32 %v384_v45, %v1190_v0  ;;  %v444_v11 = vrot.slane %v294_v3, %v1215_v8  ;;  %vm457_vm7 = vcmp.lt.s32.totalorder %v1213_v7, 111  ;;  %v283_v7 = vld [vmem:[%s1315_s2] sm:$0xff] }
  0x60   : > { %vm576_vm9 = vcmask 64512  }
  0x62   : > { %362 = vrot.lane.b32.xlu1 %v1194_v1, %s999_s10  ;;  %360 = vrot.lane.b32.xlu0 %v1190_v0, %s999_s10  ;;  %s770_s10 = sshll.u32 %s1063_s25, 7  ;;  %s1006_s25 = smov [#allocation7]  }
  0x63   : > { %s1269_s18 = scalar_lea.hbm %s1319_s6, %s770_s10  ;;  %s924_s12 = sshll.u32 %s1006_s25, 4  ;;  %s925_s12 = int_to_ptr.vmem [resolvable:$false] %s924_s12 }
  0x64   : > { %s926_s16 = scalar_lea.vmem %s925_s12, 256 }
  0x66   : > { %395 = vrot.lane.b32.xlu1 %v1194_v1, %s1000_s11  ;;  %393 = vrot.lane.b32.xlu0 %v1190_v0, %s1000_s11  ;;  %s282_s11 = scalar_lea.vmem [#allocation7], %s761_s27 }
  0x6a   : > { %415 = vrot.lane.b32.xlu1 %v1194_v1, %s1001_s20  ;;  %413 = vrot.lane.b32.xlu0 %v1190_v0, %s1001_s20  ;;  %s671_s20 = sshll.u32 %s282_s11, 4  ;;  %s1271_s20 = int_to_ptr.vmem [resolvable:$true] %s671_s20 }
  0x6b   : > { %s920_s30 = scalar_lea.vmem %s1271_s20, 128  ;;  %p927_p10 = scmp.lt.s32.totalorder %s1271_s20, %s925_s12 }
  0x6c   : > { %p921_p4 = scmp.ne.s32.totalorder %s1271_s20, %s920_s30  ;;  %p928_p13 = scmp.lt.s32.totalorder %s926_s16, %s920_s30 }
  0x6e   : > { %435 = vrot.lane.b32.xlu1 %v1194_v1, %s1004_s8  ;;  %433 = vrot.lane.b32.xlu0 %v1190_v0, %s1004_s8  ;;  %p922_p6 = pnand %p921_p4, %p1133_p12  ;;  %p929_p3 = por %p928_p13, %p927_p10 }
  0x70   : > { %p923_p8 = pneg %p922_p6 }
  0x72   : > { %455 = vrot.lane.b32.xlu1 %v1194_v1, %s1005_s15  ;;  %453 = vrot.lane.b32.xlu0 %v1190_v0, %s1005_s15  ;;  %v424_v0 = vrot.slane %v293_v2, %v1215_v8  ;;  %p930_p7 = pnand %p929_p3, %p923_p8 }
  0x76   : > { %475 = vperm.xlu0 %856, %v284_v4  }
  0xc8   : > { %v321_v12 = vpop.permute.xlu1 %320  ;;  %v299_v13 = vpop.permute.xlu0 %298 }
  0xcc   : > { %v323_v18 = vpop.permute.xlu1 %322  ;;  %v301_v19 = vpop.permute.xlu0 %300 }
  0xcd   : > { %v325_v20 = vsel %vm324_vm0, %v321_v12, %v323_v18  ;;  %v326_v21 = vsel %vm324_vm0, %v323_v18, %v321_v12  ;;  %v305_v22 = vsel %vm304_vm1, %v299_v13, %v301_v19  ;;  %v306_v23 = vsel %vm304_vm1, %v301_v19, %v299_v13  ;;  %v295_v13 = vld [vmem:[#allocation5 + $0x10] sm:$0x3] }
  0xce   : > { %v338_v24 = vmul.f32 %v331_v14, %v326_v21  ;;  %v318_v25 = vmul.f32 %v311_v15, %v306_v23  ;;  %v319_v26 = vmul.f32 %v315_v16, %v305_v22  ;;  %v339_v27 = vmul.f32 %v335_v17, %v325_v20 }
  0xcf   : > { %v448_v12 = vrot.slane %v294_v3, %v1217_v9  ;;  %v468_v20 = vrot.slane %v295_v13, %v1217_v9 }
  0xd0   : > { %v343_v30 = vpop.permute.xlu1 %342  ;;  %v341_v31 = vpop.permute.xlu0 %340  ;;  %v771_v32 = vpack.c.bf16 %v339_v27, %v319_v26  ;;  %v773_v33 = vpack.c.bf16 %v338_v24, %v318_v25  ;;  %v464_v25 = vrot.slane %v295_v13, %v1215_v8  ;;  %v286_v8 = vld [vmem:[%s1318_s5] sm:$0xf] }
  0xd1   : > { %v345_v40 = vsel %vm344_vm2, %v341_v31, %v343_v30  ;;  %v346_v41 = vsel %vm344_vm2, %v343_v30, %v341_v31  ;;  %573 = vperm.xlu1 %857, %v286_v8  }
  0xd2   : > { %772 = vmatprep.subr.bf16.mxu0 %v771_v32  ;;  %v358_v50 = vmul.f32 %v351_v35, %v346_v41  ;;  %v359_v51 = vmul.f32 %v355_v36, %v345_v40 }
  0xd3   : > { %774 = vmatpush1.bf16.msra.mxu0 %v773_v33 }
  0xd4   : > { %v363_v42 = vpop.permute.xlu1 %362  ;;  %v361_v43 = vpop.permute.xlu0 %360 }
  0xd5   : > { %v365_v46 = vsel %vm364_vm3, %v361_v43, %v363_v42  ;;  %v366_v47 = vsel %vm364_vm3, %v363_v42, %v361_v43 }
  0xd6   : > { %v378_v52 = vmul.f32 %v371_v37, %v366_v47  ;;  %v379_v53 = vmul.f32 %v375_v38, %v365_v46 }
  0xd8   : > { %v396_v54 = vpop.permute.xlu1 %395  ;;  %v394_v55 = vpop.permute.xlu0 %393  ;;  %v775_v56 = vpack.c.bf16 %v379_v53, %v359_v51  ;;  %v777_v57 = vpack.c.bf16 %v378_v52, %v358_v50 }
  0xd9   : > { %v398_v60 = vsel %vm397_vm4, %v394_v55, %v396_v54  ;;  %v399_v61 = vsel %vm397_vm4, %v396_v54, %v394_v55 }
  0xda   : > { %v411_v62 = vmul.f32 %v404_v48, %v398_v60  ;;  %v412_v63 = vmul.f32 %v408_v49, %v399_v61  ;;  %776 = vmatprep.subr.bf16.mxu0 %v775_v56  ;;  %v285_v56 = vld [vmem:[%s1317_s4] sm:$0xf] }
  0xdb   : > { %778 = vmatpush1.bf16.msra.mxu0 %v777_v57 }
  0xdc   : > { %v416_v4 = vpop.permute.xlu1 %415  ;;  %v414_v5 = vpop.permute.xlu0 %413  ;;  %v779_v6 = vpack.c.bf16 %v412_v63, %v392_v58  ;;  %v781_v1 = vpack.c.bf16 %v411_v62, %v391_v59 }
  0xdd   : > { %v418_v14 = vsel %vm417_vm5, %v414_v5, %v416_v4  ;;  %v419_v15 = vsel %vm417_vm5, %v416_v4, %v414_v5 }
  0xde   : > { %780 = vmatprep.subr.bf16.mxu0 %v779_v6  ;;  %v431_v21 = vmul.f32 %v424_v0, %v418_v14  ;;  %v432_v22 = vmul.f32 %v428_v10, %v419_v15 }
  0xdf   : > { %782 = vmatpush1.bf16.msra.mxu0 %v781_v1 }
  0xe0   : > { %v436_v16 = vpop.permute.xlu1 %435  ;;  %v434_v17 = vpop.permute.xlu0 %433 }
  0xe1   : > { %v438_v18 = vsel %vm437_vm6, %v434_v17, %v436_v16  ;;  %v439_v19 = vsel %vm437_vm6, %v436_v16, %v434_v17 }
  0xe2   : > { %v451_v23 = vmul.f32 %v444_v11, %v438_v18  ;;  %v452_v24 = vmul.f32 %v448_v12, %v439_v19 }
  0xe4   : > { %v456_v26 = vpop.permute.xlu1 %455  ;;  %v454_v27 = vpop.permute.xlu0 %453  ;;  %v783_v28 = vpack.c.bf16 %v452_v24, %v432_v22  ;;  %v785_v29 = vpack.c.bf16 %v451_v23, %v431_v21 }
  0xe5   : > { %v458_v30 = vsel %vm457_vm7, %v454_v27, %v456_v26  ;;  %v459_v31 = vsel %vm457_vm7, %v456_v26, %v454_v27 }
  0xe6   : > { %v472_v32 = vmul.f32 %v468_v20, %v459_v31  ;;  %784 = vmatprep.subr.bf16.mxu0 %v783_v28  ;;  %v471_v33 = vmul.f32 %v464_v25, %v458_v30 }
  0xe7   : > { %786 = vmatpush1.bf16.msra.mxu0 %v785_v29 }
  0xe8   : > { %498 = vmatprep.subr.mxu0 %v472_v32 }
  0xeb   : > { %499 = vmatpush1.msra.mxu0 %v471_v33 }
  0xec   : > { %762 = vmatmul.mubr.msk.f32.vlgmr.msra.gmra.mrb[0].mxu0 %vm478_vm8, %v283_v7 }
  0xf5   : > { %v476_v9 = vpop.permute.xlu0 %475 }
 0x150   : > { %v574_v57 = vpop.permute.xlu1 %573 }
 0x1bf   : > { %v548_v34 = vpop.f32.mrb[0].mxu0 }
 0x1c0   : > { %v549_v35 = vadd.f32 %v548_v34, %v476_v9  ;;  %v550_v36 = vpop.f32.mrb[1].mxu0 }
 0x1c1   : > { %v551_v37 = vadd.f32 %v550_v36, %v476_v9 }
 0x1c2   : > { %v555_v38 = vmul.f32 %v549_v35, %v549_v35  ;;  %v553_v53 = vmul.f32 0.5, %v549_v35 }
 0x1c3   : > { %v556_v39 = vmul.f32 %v551_v37, %v551_v37  ;;  %v554_v51 = vmul.f32 0.5, %v551_v37 }
 0x1c4   : > { %v557_v40 = vmul.f32 %v555_v38, %v549_v35 }
 0x1c5   : > { %v558_v41 = vmul.f32 %v556_v39, %v551_v37 }
 0x1c6   : > { %v559_v42 = vmul.f32 0.044715, %v557_v40 }
 0x1c7   : > { %v560_v43 = vmul.f32 0.044715, %v558_v41 }
 0x1c8   : > { %v561_v44 = vadd.f32 %v559_v42, %v549_v35 }
 0x1c9   : > { %v562_v45 = vadd.f32 %v560_v43, %v551_v37 }
 0x1ca   : > { %v563_v46 = vmul.f32 0.7978846, %v561_v44 }
 0x1cb   : > { %v564_v47 = vmul.f32 0.7978846, %v562_v45 }
 0x1cc   : > { %858 = vtanh.f32 %v563_v46 }
 0x1cd   : > { %860 = vtanh.f32 %v564_v47 }
 0x1d6   : > { %v859_v48 = vpop.eup %858 }
 0x1d7   : > { %v861_v49 = vpop.eup %860  ;;  %v567_v50 = vadd.f32 1.0, %v859_v48 }
 0x1d8   : > { %v568_v52 = vadd.f32 1.0, %v861_v49 }
 0x1d9   : > { %v569_v55 = vmul.f32 %v567_v50, %v553_v53 }
 0x1da   : > { %v570_v54 = vmul.f32 %v568_v52, %v554_v51 }
 0x1dc   : > { %580 = vmatprep.subr.mxu1 %v570_v54 }
 0x1dd   : > { %581 = vmatpush1.msra.mxu1 %v569_v55 }
 0x1de   : > { %763 = vmatmul.mubr.msk.f32.vlgmr.msra.gmra.mrb[0].mxu1 %vm576_vm9, %v285_v56 }
 0x2b1   : > { %v646_v58 = vpop.f32.mrb[0].mxu1 }
 0x2b2   : > { %v647_v59 = vadd.f32 %v646_v58, %v574_v57  ;;  %v648_v60 = vpop.f32.mrb[1].mxu1 }
 0x2b3   : > { %v649_v61 = vadd.f32 %v648_v60, %v574_v57 }
 0x2b5   : > { %v653_v62 = vcombine.low %v647_v59, %v649_v61 }
 0x2b7   : > { %655 = vst [vmem:[%s282_s11] sm:$0xff] %v653_v62 }
 0x2b8   : > { %933 = shalt.err (!%p930_p7)
}
 0x2b9   : > { %s934_s26 = scalar_lea.hbm %s1269_s18, 128  ;;  %s938_s19 = scalar_lea.hbm %s1319_s6, 256 }
 0x2ba   : > { %p935_p9 = scmp.ne.s32.totalorder %s1269_s18, %s934_s26  ;;  %p939_p0 = scmp.lt.u32.totalorder %s1269_s18, %s1319_s6 }
 0x2bb   : > { %p940_p1 = scmp.lt.u32.totalorder %s938_s19, %s934_s26  ;;  %p942_p4 = scmp.lt.u32.totalorder %s934_s26, %s1269_s18 }
 0x2bc   : > { %p936_p2 = pnand %p935_p9, %p1133_p12 }
 0x2bd   : > { %p941_p11 = por %p940_p1, %p939_p0 }
 0x2be   : > { %p937_p5 = pneg %p936_p2 }
 0x2bf   : > { %p943_p6 = por %p942_p4, %p941_p11 }
 0x2c1   : > { %p944_p8 = pnand %p943_p6, %p937_p5 }
 0x2c3   : > { %947 = shalt.err (!%p944_p8)
}
 0x2c4   : > { %793 = dma.vmem_to_hbm [thread:$0]  (%p1133_p12), %s1271_s20, 128, %s1269_s18, %s657_s7  }
 0x2c5 PF: > { %s683_s11 = sand.u32 1, %s978_s21   ;;  %p1334_p10 = scmp.ne.s32.totalorder %s1324_s28, 0 }
 0x2c6   : > { %p1335_p13 = scmp.ge.s32.totalorder %s990_s24, 2  ;;  %s684_s8 = scalar_lea.sflag [#allocation4], %s683_s11 }
 0x2c8   : > { %p804_p3 = pnand %p1335_p13, %p1334_p10 }
 0x2ca   : > { %973 = dma.done.wait (!%p804_p3), %s684_s8, 128  }
 0x2cb   : > { %975 = vsyncadd (!%p804_p3), %s684_s8, 4294967168  ;;  %p20_p7 = scmp.ge.s32.totalorder %s1098_s9, 4   ;;  %s1336_s21 = smov %s982_s22 }
 0x2cc   : > { %s1337_s22 = smov %s986_s23  ;;  %s1338_s23 = smov %s1129_s13 }
 0x2cd   : > { %s1339_s24 = smov %s1098_s9  ;;  %22 = sbr.rel (!%p20_p7) target bundleno = 6 (0x6), region = 93 }
 0x2d4   :  { %689 = vsyncpa [#allocation3], 1 }
 0x2d5   :  { %691 = vsyncpa [#allocation3 + $0x1], 1 }
 0x2d6   :  { %692 = vsyncpa [#allocation6], 1 }
 0x2d7   :  { %693 = vsyncpa [#allocation4], 1 }
 0x2d8   :  { %695 = vsyncpa [#allocation4 + $0x1], 1 }

</bundles_post_ra>
